<compile_context>
chip_gen: v7x
topology: tpu7x:2x2x1
jax: 0.10.0
libtpu: 0.0.40
codegen_flags: <defaults>
</compile_context>

<pallas_src>
import jax
import jax.numpy as jnp
from jax import lax
from jax.experimental import pallas as pl
from jax.experimental.pallas import tpu as pltpu


def _cdiv(a: int, b: int) -> int:
    return (a + b - 1) // b


def _round_up(a: int, b: int) -> int:
    return _cdiv(a, b) * b


def _relation_net_kernel(xp_ref, w1tp_ref, b1p_ref, w2sel_ref, b2_ref, o_ref):
    # xp_ref:    (br, 128) packed x tile (two 64-wide rows per 128 lanes)
    # w1tp_ref:  (16, 128) block-diagonal transposed fc1 weight (dtype of x)
    # b1p_ref:   (16, 1)   fc1 bias duplicated for both packed halves (f32)
    # w2sel_ref: (2, 16)   fc2 weight arranged as an even/odd selector (f32)
    # b2_ref:    (1,)      fc2 bias scalar (SMEM)
    # o_ref:     (2, br)   lane-dense output: row 0 = y[2i], row 1 = y[2i+1]
    #
    # NT contraction keeps the fc1 result lane-dense (16, br) with no large
    # transpose of a (br, 16) intermediate.
    # TODO(synk): verify with a bundle dump on v7x that Mosaic streams xp
    # through the MXU weight path here (no vxpose of a (br, 16) result).
    ht = lax.dot_general(
        w1tp_ref[...], xp_ref[...],
        dimension_numbers=(((1,), (1,)), ((), ())),
        preferred_element_type=jnp.float32,
    )                                                             # (16, br)
    h = jnp.maximum(ht + b1p_ref[...], 0.0)                       # relu(fc1)
    out2 = jnp.dot(w2sel_ref[...], h,
                   preferred_element_type=jnp.float32)            # (2, br)
    o_ref[...] = jnp.maximum(out2 + b2_ref[0], 0.0)               # relu(fc2)


def relation_network_forward(x, w1, b1, w2, b2, *, block_rows=8192,
                             return_packed=False):
    """Pallas forward of RelationNetwork.

    x:  any shape whose total size is divisible by 64 (flattened to (N, 64)).
        float32 or bfloat16 input is streamed as-is (bf16 halves HBM traffic);
        other dtypes are cast to float32.
    w1: (64, 8), b1: (8,), w2: (8, 1), b2: (1,).
    Returns (N, 1) float32 (matches the PyTorch forward).  If return_packed is
    True and N is even, returns the raw (2, N//2) slab (row 0 = y[0::2],
    row 1 = y[1::2]) so the consumer can skip the de-interleave transpose.
    """
    x_arr = jnp.asarray(x)
    if x_arr.dtype != jnp.bfloat16:
        x_arr = x_arr.astype(jnp.float32)
    x2d = x_arr.reshape(-1, 64)
    n = x2d.shape[0]

    w1f = jnp.asarray(w1, jnp.float32).reshape(64, 8)
    b1f = jnp.asarray(b1, jnp.float32).reshape(8)
    w2f = jnp.asarray(w2, jnp.float32).reshape(8)
    b2f = jnp.asarray(b2, jnp.float32).reshape(1)

    m = n // 2            # packed rows handled by the kernel
    odd = n - 2 * m       # 0 or 1 trailing rows handled outside the kernel

    if m == 0:            # degenerate single-row input: plain jnp
        h = jnp.maximum(x2d.astype(jnp.float32) @ w1f + b1f, 0.0)
        return jnp.maximum(h @ w2f.reshape(8, 1) + b2f, 0.0)

    # Pack two 64-wide rows per 128-lane row.  For even N this is a pure
    # reshape of a contiguous array (no HBM copy).  Odd N takes a prefix slice
    # (may materialize a copy; rare) and the trailing row is computed outside.
    x_main = x2d if odd == 0 else x2d[: 2 * m]
    xp = x_main.reshape(m, 128)

    # Tile size: large tiles amortize the ~0.35 us per-grid-step overhead,
    # capped so the grid has >= 4 steps where possible (2 TCs on v7x can then
    # split the "parallel" axis).  No padding: cdiv grid + uneven-block
    # masking handle a ragged final block.
    if m <= 128:
        br = m                                    # single exact block
    else:
        br = min(_round_up(max(int(block_rows), 128), 128),
                 _round_up(_cdiv(m, 4), 128))
    grid = (_cdiv(m, br),)

    # Tiny constant operands, built once in the wrapper.
    w1t = w1f.T                                               # (8, 64)
    w1tp = jnp.zeros((16, 128), jnp.float32)
    w1tp = w1tp.at[:8, :64].set(w1t).at[8:, 64:].set(w1t)     # block-diagonal
    w1tp = w1tp.astype(xp.dtype)                              # bf16 MXU if x bf16
    b1p = jnp.concatenate([b1f, b1f]).reshape(16, 1)
    w2sel = jnp.zeros((2, 16), jnp.float32)
    w2sel = w2sel.at[0, :8].set(w2f).at[1, 8:].set(w2f)       # even/odd selector

    n_main = 2 * m
    x_bytes = xp.size * xp.dtype.itemsize
    cost = pl.CostEstimate(
        flops=2 * n_main * 64 * 8 + 2 * n_main * 8,
        transcendentals=0,
        bytes_accessed=x_bytes + n_main * 4 + (16 * 128 + 16 + 2 * 16 + 1) * 4,
    )

    out = pl.pallas_call(
        _relation_net_kernel,
        out_shape=jax.ShapeDtypeStruct((2, m), jnp.float32),
        grid=grid,
        in_specs=[
            pl.BlockSpec((br, 128), lambda i: (i, 0)),           # packed x tile
            pl.BlockSpec((16, 128), lambda i: (0, 0)),           # fc1 weight
            pl.BlockSpec((16, 1), lambda i: (0, 0)),             # fc1 bias
            pl.BlockSpec((2, 16), lambda i: (0, 0)),             # fc2 selector
            pl.BlockSpec(memory_space=pltpu.MemorySpace.SMEM),   # fc2 bias scalar
        ],
        out_specs=pl.BlockSpec((2, br), lambda i: (0, i)),       # lane-dense slab
        compiler_params=pltpu.CompilerParams(
            dimension_semantics=("parallel",),
            vmem_limit_bytes=32 * 1024 * 1024,
        ),
        cost_estimate=cost,
    )(xp, w1tp, b1p, w2sel, b2f)

    if return_packed and odd == 0:
        return out                                # (2, m) even/odd slab

    # De-interleave: (2, m) -> (m, 2) -> (2m, 1).  One small XLA transpose
    # (~1.5% of total HBM traffic); use return_packed to skip it.
    y = out.T.reshape(-1, 1)
    if odd:
        x_last = x2d[2 * m:].astype(jnp.float32)                 # (1, 64)
        h_last = jnp.maximum(x_last @ w1f + b1f, 0.0)
        y_last = jnp.maximum(h_last @ w2f.reshape(8, 1) + b2f, 0.0)
        y = jnp.concatenate([y, y_last], axis=0)
    return y


def _reference_forward(x, w1, b1, w2, b2):
    x2d = jnp.asarray(x, jnp.float32).reshape(-1, 64)
    h = jnp.maximum(x2d @ jnp.asarray(w1, jnp.float32)
                    + jnp.asarray(b1, jnp.float32).reshape(1, 8), 0.0)
    return jnp.maximum(h @ jnp.asarray(w2, jnp.float32).reshape(8, 1)
                       + jnp.asarray(b2, jnp.float32).reshape(1, 1), 0.0)


if __name__ == "__main__":
    key = jax.random.PRNGKey(0)
    k_x, k_w1, k_b1, k_w2, k_b2, k_x2 = jax.random.split(key, 6)

    # Input consistent with the module: (2, 4, 16, 16) -> view(-1, 64) -> (32, 64).
    x = jax.random.normal(k_x, (2, 4, 16, 16), dtype=jnp.float32)

    # nn.Linear-style U(-1/sqrt(fan_in), 1/sqrt(fan_in)) init.
    bound1 = 1.0 / jnp.sqrt(64.0)
    w1 = jax.random.uniform(k_w1, (64, 8), minval=-bound1, maxval=bound1, dtype=jnp.float32)
    b1 = jax.random.uniform(k_b1, (8,), minval=-bound1, maxval=bound1, dtype=jnp.float32)
    bound2 = 1.0 / jnp.sqrt(8.0)
    w2 = jax.random.uniform(k_w2, (8, 1), minval=-bound2, maxval=bound2, dtype=jnp.float32)
    b2 = jax.random.uniform(k_b2, (1,), minval=-bound2, maxval=bound2, dtype=jnp.float32)

    out = jax.block_until_ready(relation_network_forward(x, w1, b1, w2, b2))
    ref = _reference_forward(x, w1, b1, w2, b2)
    assert out.shape == (32, 1), out.shape
    assert jnp.allclose(out, ref, atol=1e-5, rtol=1e-5), "mismatch (small even N)"

    # Multi-step grid, uneven final block, AND an odd trailing row.
    x2 = jax.random.normal(k_x2, (1027, 64), dtype=jnp.float32)
    out2 = jax.block_until_ready(
        relation_network_forward(x2, w1, b1, w2, b2, block_rows=256))
    ref2 = _reference_forward(x2, w1, b1, w2, b2)
    assert out2.shape == (1027, 1), out2.shape
    assert jnp.allclose(out2, ref2, atol=1e-5, rtol=1e-5), "mismatch (ragged/odd N)"

    # Optional bf16 streaming path (halves HBM traffic; f32 MXU accumulation).
    x3 = x2[:1024].astype(jnp.bfloat16)
    out3 = jax.block_until_ready(
        relation_network_forward(x3, w1, b1, w2, b2, block_rows=256))
    ref3 = _reference_forward(x3.astype(jnp.float32), w1, b1, w2, b2)
    assert out3.shape == (1024, 1), out3.shape
    assert jnp.allclose(out3, ref3, atol=5e-2, rtol=5e-2), "mismatch (bf16 path)"

    print("KERNEL_OK")
</pallas_src>

<mosaic_0001>
module attributes {stable_mosaic.version = 11 : i64} {
  func.func @_relation_net_kernel(%arg0: i32, %arg1: memref<16x128xf32, #tpu.memory_space<vmem>>, %arg2: memref<16x128xf32, #tpu.memory_space<vmem>>, %arg3: memref<16x1xf32, #tpu.memory_space<vmem>>, %arg4: memref<2x16xf32, #tpu.memory_space<vmem>>, %arg5: memref<1xf32, #tpu.memory_space<smem>>, %arg6: memref<2x16xf32, #tpu.memory_space<vmem>>) attributes {dimension_semantics = [#tpu.dimension_semantics<parallel>], iteration_bounds = array<i64: 1>, scalar_prefetch = 0 : i64, scratch_operands = 0 : i64, tpu.core_type = #tpu.core_type<tc>, window_params = [{transform_indices = @transform_0, window_bounds = array<i64: 16, 128>}, {pipeline_mode = #tpu.pipeline_mode<synchronous>, transform_indices = @transform_1, window_bounds = array<i64: 16, 128>}, {pipeline_mode = #tpu.pipeline_mode<synchronous>, transform_indices = @transform_2, window_bounds = array<i64: 16, 1>}, {pipeline_mode = #tpu.pipeline_mode<synchronous>, transform_indices = @transform_3, window_bounds = array<i64: 2, 16>}, {transform_indices = @transform_4, window_bounds = array<i64: 1>}, {transform_indices = @transform_5, window_bounds = array<i64: 2, 16>}]} {
    %c0 = arith.constant 0 : index
    %c0_0 = arith.constant 0 : index
    %0 = vector.load %arg2[%c0, %c0_0] : memref<16x128xf32, #tpu.memory_space<vmem>>, vector<16x128xf32>
    %c0_1 = arith.constant 0 : index
    %c0_2 = arith.constant 0 : index
    %1 = vector.load %arg1[%c0_1, %c0_2] : memref<16x128xf32, #tpu.memory_space<vmem>>, vector<16x128xf32>
    %cst = arith.constant dense<0.000000e+00> : vector<16x16xf32>
    %2 = tpu.matmul %0, %1, %cst {dimension_numbers = #tpu.dot_dimension_numbers<[1], [1], [0], [0], [0, 0, 1, 0], [], []>} : vector<16x128xf32>, vector<16x128xf32>, vector<16x16xf32> -> vector<16x16xf32>
    %c0_3 = arith.constant 0 : index
    %c0_4 = arith.constant 0 : index
    %3 = vector.load %arg3[%c0_3, %c0_4] : memref<16x1xf32, #tpu.memory_space<vmem>>, vector<16x1xf32>
    %4 = vector.broadcast %3 : vector<16x1xf32> to vector<16x16xf32>
    %5 = arith.addf %2, %4 : vector<16x16xf32>
    %cst_5 = arith.constant 0.000000e+00 : f32
    %6 = vector.broadcast %cst_5 : f32 to vector<16x16xf32>
    %7 = arith.maximumf %5, %6 : vector<16x16xf32>
    %c0_6 = arith.constant 0 : index
    %c0_7 = arith.constant 0 : index
    %8 = vector.load %arg4[%c0_6, %c0_7] : memref<2x16xf32, #tpu.memory_space<vmem>>, vector<2x16xf32>
    %cst_8 = arith.constant dense<0.000000e+00> : vector<2x16xf32>
    %9 = tpu.matmul %8, %7, %cst_8 {dimension_numbers = #tpu.dot_dimension_numbers<[1], [0], [0], [1], [0, 0, 1, 1], [], []>} : vector<2x16xf32>, vector<16x16xf32>, vector<2x16xf32> -> vector<2x16xf32>
    %c0_9 = arith.constant 0 : index
    %10 = memref.load %arg5[%c0_9] : memref<1xf32, #tpu.memory_space<smem>>
    %11 = vector.broadcast %10 : f32 to vector<2x16xf32>
    %12 = arith.addf %9, %11 : vector<2x16xf32>
    %cst_10 = arith.constant 0.000000e+00 : f32
    %13 = vector.broadcast %cst_10 : f32 to vector<2x16xf32>
    %14 = arith.maximumf %12, %13 : vector<2x16xf32>
    %c0_11 = arith.constant 0 : index
    %c0_12 = arith.constant 0 : index
    %15 = vector.load %arg6[%c0_11, %c0_12] : memref<2x16xf32, #tpu.memory_space<vmem>>, vector<2x16xf32>
    tpu.vector_store %arg6[%c0_11, %c0_12], %14 {strides = array<i32>} : memref<2x16xf32, #tpu.memory_space<vmem>>, vector<2x16xf32>,
    return
  }
  func.func @transform_0(%arg0: i32) -> (i32, i32) {
    %c0_i32 = arith.constant 0 : i32
    %c0_i32_0 = arith.constant 0 : i32
    return %arg0, %c0_i32 : i32, i32
  }
  func.func @transform_1(%arg0: i32) -> (i32, i32) {
    %c0_i32 = arith.constant 0 : i32
    %c0_i32_0 = arith.constant 0 : i32
    %c0_i32_1 = arith.constant 0 : i32
    return %c0_i32, %c0_i32_0 : i32, i32
  }
  func.func @transform_2(%arg0: i32) -> (i32, i32) {
    %c0_i32 = arith.constant 0 : i32
    %c0_i32_0 = arith.constant 0 : i32
    %c0_i32_1 = arith.constant 0 : i32
    return %c0_i32, %c0_i32_0 : i32, i32
  }
  func.func @transform_3(%arg0: i32) -> (i32, i32) {
    %c0_i32 = arith.constant 0 : i32
    %c0_i32_0 = arith.constant 0 : i32
    %c0_i32_1 = arith.constant 0 : i32
    return %c0_i32, %c0_i32_0 : i32, i32
  }
  func.func @transform_4(%arg0: i32) -> i32 {
    %c0_i32 = arith.constant 0 : i32
    %c0_i32_0 = arith.constant 0 : i32
    return %c0_i32 : i32
  }
  func.func @transform_5(%arg0: i32) -> (i32, i32) {
    %c0_i32 = arith.constant 0 : i32
    %c0_i32_0 = arith.constant 0 : i32
    return %c0_i32, %arg0 : i32, i32
  }
}

</mosaic_0001>

<bundles_post_ra>
// kernel: tpu_custom_call.1
= control target key start
LH: loop header
LB: loop body
LE: loop exit
PB: predicated region body
PF: predicated region fallthrough
CT: control target
= control target key end

     0   :  { %11 = vsyncpa [#allocation4], 0  ;;  %s390_s0 = inlined_call_operand.vmem [shape: f32[16,128], index: 0, kind: input, shape index: {}]   ;;  %s391_s1 = inlined_call_operand.hbm [shape: f32[16,128], index: 1, kind: input, shape index: {}]   ;;  %s392_s2 = inlined_call_operand.vmem [shape: f32[16,1], index: 2, kind: input, shape index: {}]   ;;  %s393_s3 = inlined_call_operand.vmem [shape: f32[2,16], index: 3, kind: input, shape index: {}]   ;;  %s394_s4 = inlined_call_operand.<no memory space> [shape: f32[1], index: 4, kind: input, shape index: {}]   ;;  %s395_s5 = inlined_call_operand.hbm [shape: f32[2,16], index: 5, kind: output, shape index: {}]  }
   0x1   :  { %12 = vsyncpa [#allocation5], 0  ;;  %s310_s18 = smov [#allocation3]   ;;  %s262_s22 = scalar_lea.hbm %s391_s1, 256 }
   0x2   :  { %s20_s19 = sshll.u32 %s310_s18, 4  ;;  %p263_p0 = scmp.ne.s32.totalorder %s391_s1, %s262_s22  ;;  %s21_s19 = int_to_ptr.vmem [resolvable:$true] %s20_s19 }
   0x3   :  { %p266_p1 = scmp.lt.u32.totalorder %s262_s22, %s391_s1 }
   0x5   :  { %p268_p2 = pnand %p266_p1, %p263_p0 }
   0x7   :  { %271 = shalt.err (!%p268_p2)
}
   0x8   :  { %s272_s27 = scalar_lea.vmem %s21_s19, 256  ;;  %p277_p4 = scmp.lt.s32.totalorder %s21_s19, %s21_s19 }
   0x9   :  { %p273_p3 = scmp.ne.s32.totalorder %s21_s19, %s272_s27  ;;  %p278_p5 = scmp.lt.s32.totalorder %s272_s27, %s272_s27 }
   0xb   :  { %p279_p6 = por %p278_p5, %p277_p4 }
   0xd   :  { %p280_p7 = pnand %p279_p6, %p273_p3 }
   0xf   :  { %283 = shalt.err (!%p280_p7)
}
  0x10   :  { %s311_s28 = smov 128   ;;  %s312_s29 = smov 8  }
  0x11   :  { %26 = dma.hbm_to_vmem [thread:$0]  %s391_s1, 256, %s21_s19, [#allocation4], %s311_s28, %s311_s28, %s312_s29  }
  0x12   :  { %306 = dma.done.wait [#allocation4], 256  }
  0x13   :  { %307 = vsyncadd [#allocation4], 4294967040  ;;  %v313_v0 = vmov 0   ;;  %v38_v1 = vld [vmem:[%s390_s0] sm:$0xff]  ;;  %v39_v2 = vld [vmem:[%s390_s0 + $0x8] sm:$0xff]  ;;  %v314_v8 = vmov 0.0|0.0   ;;  %v131_v20 = vstv %s394_s4 }
  0x14   :  { %261 = vset.pattern.permute.xlu0 %v313_v0  ;;  %v36_v3 = vld [vmem:[#allocation3] sm:$0xff]  ;;  %v246_v4 = vpack.c.bf16 %v39_v2, %v38_v1  ;;  %v41_v6 = vld [vmem:[%s392_s2 + $0x8] sm:$0xff]  ;;  %250 = vmatprep.subr.bf16.mxu1 %v314_v8  ;;  %vm315_vm0 = vmmov 0   ;;  %v316_v9 = vmov 0.0   ;;  %vm132_vm1 = vcmask 130048   ;;  %s317_s16 = smov [#allocation6]  }
  0x15   :  { %236 = vmatprep.mubr.f32.mxu0 %v36_v3  ;;  %v40_v5 = vld [vmem:[%s392_s2] sm:$0xff]  ;;  %v37_v7 = vld [vmem:[#allocation3 + $0x8] sm:$0xff]  ;;  %243 = vmatprep.mubr.msk.f32.mxu1 %vm315_vm0, %v316_v9  ;;  %s215_s17 = sshll.u32 %s317_s16, 4  ;;  %vm207_vm2 = vcmask 123904   ;;  %s216_s17 = int_to_ptr.vmem [resolvable:$true] %s215_s17 }
  0x16   :  { %44 = vperm.xlu0 %261, %v40_v5   ;;  %247 = vmatprep.subr.bf16.mxu0 %v246_v4  ;;  %v129_v19 = vld [vmem:[%s393_s3] sm:$0x3]  ;;  %s284_s18 = scalar_lea.vmem %s216_s17, 32  ;;  %p289_p9 = scmp.lt.s32.totalorder %s216_s17, %s216_s17 }
  0x17   :  { %249 = vmatpush3.bf16.xpose.msra.mxu0 %v246_v4  ;;  %p285_p8 = scmp.ne.s32.totalorder %s216_s17, %s284_s18  ;;  %p290_p10 = scmp.lt.s32.totalorder %s284_s18, %s284_s18 }
  0x19   :  { %p291_p11 = por %p290_p10, %p289_p9 }
  0x1a   :  { %49 = vperm.xlu0 %261, %v41_v6  }
  0x1b   :  { %p292_p12 = pnand %p291_p11, %p285_p8 }
  0x1e   :  { %237 = vmatmul.mubr.f32.vlgmr.msra.gmra.mrb[0].mxu0 %v37_v7 }
  0x95   :  { %v45_v10 = vpop.permute.xlu0 %44 }
  0x99   :  { %v50_v11 = vpop.permute.xlu0 %49 }
  0xf1   :  { %v238_v12 = vpop.f32.mrb[0].mxu0 }
  0xf2   :  { %v124_v13 = vadd.f32 %v238_v12, %v50_v11  ;;  %v118_v14 = vpop.f32.mrb[1].mxu0 }
  0xf3   :  { %v119_v15 = vadd.f32 %v118_v14, %v45_v10 }
  0xf4   :  { %v128_v16 = vmax.f32 %v124_v13, 0.0 }
  0xf5   :  { %v127_v17 = vmax.f32 %v119_v15, 0.0 }
  0xf7   :  { %v251_v18 = vpack.c.bf16 %v128_v16, %v127_v17 }
  0xf9   :  { %252 = vmatpush3.bf16.msra.mxu1 %v251_v18 }
  0xfc   :  { %244 = vmatmul.mubr.msk.f32.vlgmr.msra.gmra.mrb[0].mxu1 %vm132_vm1, %v129_v19 }
 0x1cf   :  { %v202_v21 = vpop.f32.mrb[0].mxu1 }
 0x1d0   :  { %v203_v22 = vadd.f32 %v202_v21, %v131_v20  ;;  %v245_v23 = vpop.f32.mrb[1].mxu1 }
 0x1d2   :  { %v206_v24 = vmax.f32 %v203_v22, 0.0 }
 0x1d4   :  { %208 = vst.msk [vmem:[#allocation6] sm:$0x3] %vm207_vm2, %v206_v24 }
 0x1d5   :  { %295 = shalt.err (!%p292_p12)
}
 0x1d6   :  { %s296_s4 = scalar_lea.hbm %s395_s5, 32 }
 0x1d7   :  { %p297_p13 = scmp.ne.s32.totalorder %s395_s5, %s296_s4  ;;  %p300_p0 = scmp.lt.u32.totalorder %s296_s4, %s395_s5 }
 0x1d9   :  { %p302_p1 = pnand %p300_p0, %p297_p13 }
 0x1db   :  { %305 = shalt.err (!%p302_p1)
}
 0x1dc   :  { %218 = dma.vmem_to_hbm [thread:$0]  %s216_s17, 32, %s395_s5, [#allocation5]  }
 0x1dd   :  { %308 = dma.done.wait [#allocation5], 32  }
 0x1de   :  { %309 = vsyncadd [#allocation5], 4294967264 }
 0x1df   :  { %222 = vsyncpa [#allocation4], 1 }
 0x1e0   :  { %223 = vsyncpa [#allocation5], 1 }

</bundles_post_ra>
